<compile_context>
chip_gen: v6e
topology: v6e:2x2x1
jax: 0.10.0
libtpu: 0.0.40
codegen_flags: <defaults>
</compile_context>

<pallas_src>
import functools
import math

import jax
import jax.numpy as jnp
from jax.experimental import pallas as pl
from jax.experimental.pallas import tpu as pltpu


_LANE_COLS = 8 * 128                       # preferred lane-dense last dim
_TARGET_TILE_BYTES = 6 * 1024 * 1024       # ~6 MiB tiles: 4 bufs fit all chips
_SPLIT_THRESHOLD_BYTES = 1 * 1024 * 1024   # split >=2 tiles above this (v7x, 2 TCs)


def _scale_kernel(x_ref, o_ref, *, scale):
    o_ref[...] = (x_ref[...] * scale).astype(o_ref.dtype)


def scale_forward(x: jax.Array, scale: float) -> jax.Array:
    """Equivalent of Scale.forward: returns x * scale, same shape/dtype."""
    orig_shape = x.shape
    total = x.size
    itemsize = jnp.dtype(x.dtype).itemsize
    # dtype-aware sublane minimum: 8 (f32), 16 (bf16/f16), 32 (int8/fp8).
    min_sublanes = max(8, 32 // itemsize)

    # Lane-dense column count that divides the element count -> no padding and
    # no trailing slice on the common path (full-width unmasked vector stores).
    cols = math.gcd(total, _LANE_COLS)
    if cols >= 128:
        padded_total = total
    else:
        # TODO(synk): rare ragged case (total not a multiple of 128) still pays
        # one extra HBM round trip for the pad + slice; never hit by NN shapes.
        cols = 128
        padded_total = pl.cdiv(total, cols) * cols

    flat = x.reshape(-1)
    if padded_total != total:
        flat = jnp.pad(flat, (0, padded_total - total))
    rows = padded_total // cols
    x2 = flat.reshape(rows, cols)

    if rows < min_sublanes:
        # Tiny input: block_shape == full array dims bypasses the (8,128) rule,
        # so we never pad 2 rows up to 8.
        tile_rows = rows
    else:
        tile_rows = max(
            min_sublanes,
            (_TARGET_TILE_BYTES // (cols * itemsize)) // min_sublanes * min_sublanes,
        )
        # Don't allocate a VMEM block larger than the (rounded-up) array.
        tile_rows = min(tile_rows, pl.cdiv(rows, min_sublanes) * min_sublanes)
        # v7x: make sure non-trivial inputs produce >= 2 grid steps so both
        # TensorCores stream data under dimension_semantics=("parallel",).
        if (rows <= tile_rows
                and rows >= 2 * min_sublanes
                and padded_total * itemsize >= _SPLIT_THRESHOLD_BYTES):
            tile_rows = pl.cdiv(pl.cdiv(rows, 2), min_sublanes) * min_sublanes

    # cdiv grid: the partial last block (if any) has masked OOB writes and
    # harmless garbage reads -> no padding of the row axis needed.
    grid = (pl.cdiv(rows, tile_rows),)

    kernel = functools.partial(_scale_kernel, scale=scale)

    out2 = pl.pallas_call(
        kernel,
        out_shape=jax.ShapeDtypeStruct((rows, cols), x.dtype),
        grid=grid,
        in_specs=[pl.BlockSpec((tile_rows, cols), lambda i: (i, 0))],
        out_specs=pl.BlockSpec((tile_rows, cols), lambda i: (i, 0)),
        cost_estimate=pl.CostEstimate(
            flops=padded_total,
            bytes_accessed=2 * padded_total * itemsize,
            transcendentals=0,
        ),
        compiler_params=pltpu.CompilerParams(
            dimension_semantics=("parallel",),
            vmem_limit_bytes=40 * 1024 * 1024,
        ),
    )(x2)

    out = out2.reshape(-1)
    if padded_total != total:
        out = out[:total]
    return out.reshape(orig_shape)


if __name__ == "__main__":
    key = jax.random.PRNGKey(0)
    # NCHW input, small shapes (batch=2, channels=4, spatial=16).
    x = jax.random.normal(key, (2, 4, 16, 16), dtype=jnp.float32)
    scale = 2.5  # deterministic "parameter" matching Scale(scale=2.5)

    y = scale_forward(x, scale)
    jax.block_until_ready(y)

    # Correctness check against the plain-JAX reference of the PyTorch forward.
    ref = x * scale
    assert y.shape == x.shape and y.dtype == x.dtype
    assert jnp.allclose(y, ref, atol=1e-6, rtol=1e-6)

    print("KERNEL_OK")
</pallas_src>

<mosaic_0001>
module attributes {stable_mosaic.version = 11 : i64} {
  func.func @_scale_kernel(%arg0: i32, %arg1: memref<2x1024xf32, #tpu.memory_space<vmem>>, %arg2: memref<2x1024xf32, #tpu.memory_space<vmem>>) attributes {dimension_semantics = [#tpu.dimension_semantics<parallel>], iteration_bounds = array<i64: 1>, scalar_prefetch = 0 : i64, scratch_operands = 0 : i64, tpu.core_type = #tpu.core_type<tc>, window_params = [{transform_indices = @transform_0, window_bounds = array<i64: 2, 1024>}, {transform_indices = @transform_1, window_bounds = array<i64: 2, 1024>}]} {
    %c0 = arith.constant 0 : index
    %c0_0 = arith.constant 0 : index
    %0 = vector.load %arg1[%c0, %c0_0] : memref<2x1024xf32, #tpu.memory_space<vmem>>, vector<2x1024xf32>
    %cst = arith.constant 2.500000e+00 : f32
    %1 = vector.broadcast %cst : f32 to vector<2x1024xf32>
    %2 = arith.mulf %0, %1 : vector<2x1024xf32>
    %c0_1 = arith.constant 0 : index
    %c0_2 = arith.constant 0 : index
    %3 = vector.load %arg2[%c0_1, %c0_2] : memref<2x1024xf32, #tpu.memory_space<vmem>>, vector<2x1024xf32>
    tpu.vector_store %arg2[%c0_1, %c0_2], %2 {strides = array<i32>} : memref<2x1024xf32, #tpu.memory_space<vmem>>, vector<2x1024xf32>,
    return
  }
  func.func @transform_0(%arg0: i32) -> (i32, i32) {
    %c0_i32 = arith.constant 0 : i32
    %c0_i32_0 = arith.constant 0 : i32
    return %arg0, %c0_i32 : i32, i32
  }
  func.func @transform_1(%arg0: i32) -> (i32, i32) {
    %c0_i32 = arith.constant 0 : i32
    %c0_i32_0 = arith.constant 0 : i32
    return %arg0, %c0_i32 : i32, i32
  }
}

</mosaic_0001>

<bundles_post_ra>
// kernel: tpu_custom_call.1
= control target key start
LH: loop header
LB: loop body
LE: loop exit
PB: predicated region body
PF: predicated region fallthrough
CT: control target
= control target key end

     0   :  { %6 = vsyncpa [#allocation3], 0  ;;  %s106_s0 = inlined_call_operand.hbm [shape: f32[2,1024], index: 0, kind: input, shape index: {}]   ;;  %s107_s1 = inlined_call_operand.hbm [shape: f32[2,1024], index: 1, kind: output, shape index: {}]  }
   0x1   :  { %7 = vsyncpa [#allocation4], 0  ;;  %s88_s6 = smov [#allocation2]  }
   0x2   :  { %s14_s7 = sshll.u32 %s88_s6, 4  ;;  %s15_s7 = int_to_ptr.vmem [resolvable:$true] %s14_s7 }
   0x3   :  { %s52_s8 = scalar_lea.vmem %s15_s7, 256  ;;  %p57_p1 = scmp.lt.s32.totalorder %s15_s7, %s15_s7 }
   0x4   :  { %p53_p0 = scmp.ne.s32.totalorder %s15_s7, %s52_s8  ;;  %p58_p2 = scmp.lt.s32.totalorder %s52_s8, %s52_s8 }
   0x6   :  { %p59_p3 = por %p58_p2, %p57_p1 }
   0x8   :  { %p60_p4 = pnand %p59_p3, %p53_p0 }
   0xa   :  { %63 = shalt.err (!%p60_p4)
}
   0xb   :  { %17 = dma.hbm_to_vmem [thread:$0]  %s106_s0, 256, %s15_s7, [#allocation3]  }
   0xc   :  { %84 = dma.done.wait [#allocation3], 256  }
   0xd   :  { %85 = vsyncadd [#allocation3], 4294967040  ;;  %s89_s11 = smov [#allocation5]   ;;  %v21_v0 = vld [vmem:[#allocation2] sm:$0xff]  ;;  %v22_v1 = vld [vmem:[#allocation2 + $0x8] sm:$0xff] }
   0xe   :  { %s33_s12 = sshll.u32 %s89_s11, 4  ;;  %v23_v2 = vmul.f32 2.5, %v21_v0  ;;  %v24_v3 = vmul.f32 2.5, %v22_v1  ;;  %s34_s12 = int_to_ptr.vmem [resolvable:$true] %s33_s12 }
   0xf   :  { %s64_s13 = scalar_lea.vmem %s34_s12, 256  ;;  %p69_p6 = scmp.lt.s32.totalorder %s34_s12, %s34_s12 }
  0x10   :  { %25 = vst [vmem:[#allocation5] sm:$0xff] %v23_v2  ;;  %26 = vst [vmem:[#allocation5 + $0x8] sm:$0xff] %v24_v3  ;;  %p65_p5 = scmp.ne.s32.totalorder %s34_s12, %s64_s13  ;;  %p70_p7 = scmp.lt.s32.totalorder %s64_s13, %s64_s13 }
  0x12   :  { %p71_p8 = por %p70_p7, %p69_p6 }
  0x14   :  { %p72_p9 = pnand %p71_p8, %p65_p5 }
  0x16   :  { %75 = shalt.err (!%p72_p9)
}
  0x17   :  { %36 = dma.vmem_to_hbm [thread:$0]  %s34_s12, 256, %s107_s1, [#allocation4]  }
  0x18   :  { %86 = dma.done.wait [#allocation4], 256  }
  0x19   :  { %87 = vsyncadd [#allocation4], 4294967040 }
  0x1a   :  { %40 = vsyncpa [#allocation3], 1 }
  0x1b   :  { %41 = vsyncpa [#allocation4], 1 }

</bundles_post_ra>
